<compile_context>
chip_gen: v7x
topology: tpu7x:2x2x1
jax: 0.10.0
libtpu: 0.0.40
codegen_flags: <defaults>
</compile_context>

<pallas_src>
import jax
import jax.numpy as jnp
from jax.experimental import pallas as pl
from jax.experimental.pallas import tpu as pltpu

_LANE = 128
_SUBLANE = 8


def _round_up(x, m):
    return ((x + m - 1) // m) * m


# ---------------------------------------------------------------------------
# Pallas kernel: o[s, :] = sum_d I[s, :, d] * U[:, d]
#   users on the lane-dense output axis, D reduced on the lane axis (XLU).
# ---------------------------------------------------------------------------
def _rank_sets_kernel(u_ref, i_ref, o_ref):
    # u_ref: (n_tile, D)          bf16  gathered user embeddings (natural layout)
    # i_ref: (s_blk, n_tile, D)   bf16  gathered item embeddings for this set block
    # o_ref: (s_blk, n_tile)      f32   lane-dense output slab
    u = u_ref[...].astype(jnp.float32)            # upcast once (safe on v5e VPU)
    for s in range(i_ref.shape[0]):               # static, fully unrolled (s_blk <= 16)
        prod = i_ref[s].astype(jnp.float32) * u   # short-lived (n_tile, D) f32 temp
        o_ref[s, :] = jnp.sum(prod, axis=-1)      # lane reduction -> (n_tile,)


def _select_tiling(n, num_sets, d):
    """Budget-driven tile selection (VMEM + HBM-bytes-per-step aware)."""
    # lane padding of the D-minor blocks as they sit in VMEM
    d_pad = _round_up(max(d, 1), _LANE)
    # set block: all sets when small, else blocks of 8 (keeps output's
    # second-to-last dim a multiple of 8) with a second parallel grid axis
    s_blk = num_sets if num_sets <= 16 else 8
    s_pad = _round_up(s_blk, _SUBLANE)

    # double-buffered VMEM bytes per unit of n (bf16 inputs, f32 output), padded
    bytes_per_n = 2 * ((s_blk + 1) * d_pad * 2 + s_pad * 4)
    VMEM_IO_BUDGET = 8 << 20           # per-step I/O budget; leaves headroom on
                                       # v5e (16 MiB scoped) and v7x (64 MiB phys)
    n_budget = max(_LANE, (VMEM_IO_BUDGET // bytes_per_n) // _LANE * _LANE)
    n_budget = min(n_budget, 4096)     # cap in-kernel f32 temporaries / vreg pressure

    if n <= _LANE:
        n_tile = n                     # single full-dim block (legal for any n)
    elif n <= n_budget:
        # fits one step: still split into >=2 lane-aligned steps so v7x's
        # second TensorCore gets work (neutral on v5e/v6e)
        n_tile = min(n_budget, _round_up(pl.cdiv(n, 2), _LANE))
    else:
        n_tile = n_budget
    return n_tile, s_blk


def rank_citing_vs_item_sets(user_emb, item_set_emb):
    """
    user_emb:     (n, D)            bf16, gathered citing-user embeddings
    item_set_emb: (num_sets, n, D)  bf16, gathered cited-item embeddings
    returns:      (num_sets, n)     f32 ranks (caller transposes to (n, sets))
    """
    n, d = user_emb.shape
    num_sets = item_set_emb.shape[0]
    n_tile, s_blk = _select_tiling(n, num_sets, d)

    # set axis innermost: the user tile's block index is constant across it,
    # so Pallas does not re-DMA the user tile between consecutive set blocks.
    grid = (pl.cdiv(n, n_tile), pl.cdiv(num_sets, s_blk))

    return pl.pallas_call(
        _rank_sets_kernel,
        out_shape=jax.ShapeDtypeStruct((num_sets, n), jnp.float32),
        grid_spec=pltpu.PrefetchScalarGridSpec(
            num_scalar_prefetch=0,
            grid=grid,
            in_specs=[
                # i-th user tile (users on sublanes, D on lanes) — independent of j
                pl.BlockSpec((n_tile, d), lambda i, j: (i, 0)),
                # j-th set block for the i-th user tile
                pl.BlockSpec((s_blk, n_tile, d), lambda i, j: (j, i, 0)),
            ],
            # lane-dense (s_blk, n_tile) output slab per grid step
            out_specs=pl.BlockSpec((s_blk, n_tile), lambda i, j: (j, i)),
        ),
        compiler_params=pltpu.CompilerParams(
            # both axes independent -> shard across TensorCores on v7x,
            # neutral on v5e/v6e (1 TC).
            dimension_semantics=("parallel", "parallel"),
            vmem_limit_bytes=32 << 20,
        ),
    )(user_emb, item_set_emb)


# ---------------------------------------------------------------------------
# Whole predict path under one jit: gather + kernel + final transpose fuse
# into a single XLA executable (no intermediate HBM round trips / dispatches).
# ---------------------------------------------------------------------------
@jax.jit
def _rank_forward_jit(user_table, item_table, user_idxs, item_idx_mat):
    # user_idxs: (n,) int32; item_idx_mat: (num_sets, n) int32
    user_emb = jnp.take(user_table, user_idxs, axis=0)        # (n, D)    bf16
    item_emb = jnp.take(item_table, item_idx_mat, axis=0)     # (S, n, D) bf16
    ranks_sn = rank_citing_vs_item_sets(user_emb, item_emb)   # (S, n)    f32
    return ranks_sn.T                                         # (n, S)


# ---------------------------------------------------------------------------
# Module wrapper mirroring RankingModule.forward semantics
# ---------------------------------------------------------------------------
class RankingModuleJAX:
    def __init__(self, num_users, num_items, emb_dim, key):
        ku, ki = jax.random.split(key)
        # deterministic synthetic parameters, stored bf16 (streamed dtype)
        self.user_table = (
            jax.random.normal(ku, (num_users, emb_dim), jnp.float32) * 0.1
        ).astype(jnp.bfloat16)
        self.item_table = (
            jax.random.normal(ki, (num_items, emb_dim), jnp.float32) * 0.1
        ).astype(jnp.bfloat16)

    def get_net_name(self):
        return "pallas_dot_ranker"

    def get_run_name(self):
        return "pallas_dot_ranker_run0"

    # concrete instantiation of the abstract per-pair scorer
    def rank_citation_pairs(self, citing, cited):
        user_idxs = citing[0]                                   # (n,)
        n = user_idxs.shape[0]
        cited = jnp.asarray(cited)
        assert cited.ndim == 0 or cited.shape[0] in (1, n), (
            "cited must be broadcastable to the number of citing users")
        item_idx_mat = jnp.broadcast_to(cited, (n,))[None]      # (1, n)
        ranks = _rank_forward_jit(self.user_table, self.item_table,
                                  user_idxs, item_idx_mat)      # (n, 1)
        return ranks[:, 0]

    def forward(self, citing, cited_sets):
        """
        citing:     tuple whose first element is an int32 array of user idxs, shape (n,)
        cited_sets: list of int32 arrays, each broadcastable to (n,)
        returns:    float32 ranks of shape (n, len(cited_sets))
        """
        if citing[0].shape[0] == 1 and cited_sets is None:
            # TODO(synk): rank_all_cases is abstract in the reference module; not implemented.
            raise NotImplementedError("rank_all_cases not defined by the base module")
        return self.predict_for_citing_and_subsets_of_items(citing, cited_sets)

    def predict_for_citing_and_subsets_of_items(self, citing, cited_sets):
        user_idxs = citing[0]                                   # (n,)
        n = user_idxs.shape[0]
        item_idx_mat = jnp.stack(
            [jnp.broadcast_to(s, (n,)) for s in cited_sets], axis=0
        )                                                       # (num_sets, n)
        # PyTorch ranks[:, i] column convention
        return _rank_forward_jit(self.user_table, self.item_table,
                                 user_idxs, item_idx_mat)       # (n, num_sets)


# ---------------------------------------------------------------------------
# Main
# ---------------------------------------------------------------------------
if __name__ == "__main__":
    key = jax.random.PRNGKey(0)
    k_mod, k_u, k_i, k_u2, k_i2 = jax.random.split(key, 5)

    NUM_USERS, NUM_ITEMS, EMB_DIM = 64, 64, 32
    N_PAIRS, NUM_SETS = 8, 4

    module = RankingModuleJAX(NUM_USERS, NUM_ITEMS, EMB_DIM, k_mod)

    # ---- primary (small) test: mirrors the PyTorch API --------------------
    citing = (jax.random.randint(k_u, (N_PAIRS,), 0, NUM_USERS, dtype=jnp.int32),)
    cited_sets = [
        jax.random.randint(jax.random.fold_in(k_i, s), (N_PAIRS,), 0, NUM_ITEMS,
                           dtype=jnp.int32)
        for s in range(NUM_SETS)
    ]

    ranks = jax.block_until_ready(module.forward(citing, cited_sets))

    # reference in plain JAX (identical bf16 -> f32 upcast, f32 math)
    u = jnp.take(module.user_table, citing[0], axis=0).astype(jnp.float32)
    ref = jnp.stack(
        [jnp.sum(u * jnp.take(module.item_table, s, axis=0).astype(jnp.float32), -1)
         for s in cited_sets], axis=1)

    assert ranks.shape == (N_PAIRS, NUM_SETS)
    assert jnp.allclose(ranks, ref, atol=1e-5, rtol=1e-5)

    # per-pair scorer path (single item set)
    pair_ranks = jax.block_until_ready(
        module.rank_citation_pairs(citing, cited_sets[0]))
    assert pair_ranks.shape == (N_PAIRS,)
    assert jnp.allclose(pair_ranks, ref[:, 0], atol=1e-5, rtol=1e-5)

    # ---- secondary test: exercises the tiled multi-block grid path --------
    #   n=384 -> >=2 lane-aligned n-tiles (v7x parallel steps, partial tail)
    #   S=20  -> set-block grid axis (blocks of 8, partial last block)
    N2, S2 = 384, 20
    citing2 = (jax.random.randint(k_u2, (N2,), 0, NUM_USERS, dtype=jnp.int32),)
    cited_sets2 = [
        jax.random.randint(jax.random.fold_in(k_i2, s), (N2,), 0, NUM_ITEMS,
                           dtype=jnp.int32)
        for s in range(S2)
    ]
    ranks2 = jax.block_until_ready(module.forward(citing2, cited_sets2))
    u2 = jnp.take(module.user_table, citing2[0], axis=0).astype(jnp.float32)
    ref2 = jnp.stack(
        [jnp.sum(u2 * jnp.take(module.item_table, s, axis=0).astype(jnp.float32), -1)
         for s in cited_sets2], axis=1)
    assert ranks2.shape == (N2, S2)
    assert jnp.allclose(ranks2, ref2, atol=1e-5, rtol=1e-5)

    print("KERNEL_OK")
</pallas_src>

<mosaic_0001>
module attributes {stable_mosaic.version = 11 : i64} {
  func.func @_rank_sets_kernel(%arg0: i32, %arg1: i32, %arg2: memref<8x32xbf16, #tpu.memory_space<vmem>>, %arg3: memref<4x8x32xbf16, #tpu.memory_space<vmem>>, %arg4: memref<4x8xf32, #tpu.memory_space<vmem>>) attributes {dimension_semantics = [#tpu.dimension_semantics<parallel>, #tpu.dimension_semantics<parallel>], iteration_bounds = array<i64: 1, 1>, scalar_prefetch = 0 : i64, scratch_operands = 0 : i64, tpu.core_type = #tpu.core_type<tc>, window_params = [{transform_indices = @transform_0, window_bounds = array<i64: 8, 32>}, {transform_indices = @transform_1, window_bounds = array<i64: 4, 8, 32>}, {transform_indices = @transform_2, window_bounds = array<i64: 4, 8>}]} {
    %c0 = arith.constant 0 : index
    %c0_0 = arith.constant 0 : index
    %0 = vector.load %arg2[%c0, %c0_0] : memref<8x32xbf16, #tpu.memory_space<vmem>>, vector<8x32xbf16>
    %1 = arith.extf %0 : vector<8x32xbf16> to vector<8x32xf32>
    %c0_1 = arith.constant 0 : index
    %c0_2 = arith.constant 0 : index
    %c0_3 = arith.constant 0 : index
    %2 = vector.load %arg3[%c0_1, %c0_2, %c0_3] : memref<4x8x32xbf16, #tpu.memory_space<vmem>>, vector<1x8x32xbf16>
    %3 = vector.shape_cast %2 : vector<1x8x32xbf16> to vector<8x32xbf16>
    %4 = arith.extf %3 : vector<8x32xbf16> to vector<8x32xf32>
    %5 = arith.mulf %4, %1 : vector<8x32xf32>
    %cst = arith.constant dense<0.000000e+00> : vector<8xf32>
    %6 = vector.multi_reduction <add>, %5, %cst [1] : vector<8x32xf32> to vector<8xf32>
    %c0_4 = arith.constant 0 : index
    %c0_5 = arith.constant 0 : index
    %7 = vector.load %arg4[%c0_4, %c0_5] : memref<4x8xf32, #tpu.memory_space<vmem>>, vector<1x8xf32>
    %8 = vector.shape_cast %7 : vector<1x8xf32> to vector<8xf32>
    %9 = vector.shape_cast %6 : vector<8xf32> to vector<1x8xf32>
    tpu.vector_store %arg4[%c0_4, %c0_5], %9 {strides = array<i32>} : memref<4x8xf32, #tpu.memory_space<vmem>>, vector<1x8xf32>,
    %c1 = arith.constant 1 : index
    %c0_6 = arith.constant 0 : index
    %c0_7 = arith.constant 0 : index
    %10 = vector.load %arg3[%c1, %c0_6, %c0_7] : memref<4x8x32xbf16, #tpu.memory_space<vmem>>, vector<1x8x32xbf16>
    %11 = vector.shape_cast %10 : vector<1x8x32xbf16> to vector<8x32xbf16>
    %12 = arith.extf %11 : vector<8x32xbf16> to vector<8x32xf32>
    %13 = arith.mulf %12, %1 : vector<8x32xf32>
    %cst_8 = arith.constant dense<0.000000e+00> : vector<8xf32>
    %14 = vector.multi_reduction <add>, %13, %cst_8 [1] : vector<8x32xf32> to vector<8xf32>
    %c1_9 = arith.constant 1 : index
    %c0_10 = arith.constant 0 : index
    %15 = vector.load %arg4[%c1_9, %c0_10] : memref<4x8xf32, #tpu.memory_space<vmem>>, vector<1x8xf32>
    %16 = vector.shape_cast %15 : vector<1x8xf32> to vector<8xf32>
    %17 = vector.shape_cast %14 : vector<8xf32> to vector<1x8xf32>
    tpu.vector_store %arg4[%c1_9, %c0_10], %17 {strides = array<i32>} : memref<4x8xf32, #tpu.memory_space<vmem>>, vector<1x8xf32>,
    %c2 = arith.constant 2 : index
    %c0_11 = arith.constant 0 : index
    %c0_12 = arith.constant 0 : index
    %18 = vector.load %arg3[%c2, %c0_11, %c0_12] : memref<4x8x32xbf16, #tpu.memory_space<vmem>>, vector<1x8x32xbf16>
    %19 = vector.shape_cast %18 : vector<1x8x32xbf16> to vector<8x32xbf16>
    %20 = arith.extf %19 : vector<8x32xbf16> to vector<8x32xf32>
    %21 = arith.mulf %20, %1 : vector<8x32xf32>
    %cst_13 = arith.constant dense<0.000000e+00> : vector<8xf32>
    %22 = vector.multi_reduction <add>, %21, %cst_13 [1] : vector<8x32xf32> to vector<8xf32>
    %c2_14 = arith.constant 2 : index
    %c0_15 = arith.constant 0 : index
    %23 = vector.load %arg4[%c2_14, %c0_15] : memref<4x8xf32, #tpu.memory_space<vmem>>, vector<1x8xf32>
    %24 = vector.shape_cast %23 : vector<1x8xf32> to vector<8xf32>
    %25 = vector.shape_cast %22 : vector<8xf32> to vector<1x8xf32>
    tpu.vector_store %arg4[%c2_14, %c0_15], %25 {strides = array<i32>} : memref<4x8xf32, #tpu.memory_space<vmem>>, vector<1x8xf32>,
    %c3 = arith.constant 3 : index
    %c0_16 = arith.constant 0 : index
    %c0_17 = arith.constant 0 : index
    %26 = vector.load %arg3[%c3, %c0_16, %c0_17] : memref<4x8x32xbf16, #tpu.memory_space<vmem>>, vector<1x8x32xbf16>
    %27 = vector.shape_cast %26 : vector<1x8x32xbf16> to vector<8x32xbf16>
    %28 = arith.extf %27 : vector<8x32xbf16> to vector<8x32xf32>
    %29 = arith.mulf %28, %1 : vector<8x32xf32>
    %cst_18 = arith.constant dense<0.000000e+00> : vector<8xf32>
    %30 = vector.multi_reduction <add>, %29, %cst_18 [1] : vector<8x32xf32> to vector<8xf32>
    %c3_19 = arith.constant 3 : index
    %c0_20 = arith.constant 0 : index
    %31 = vector.load %arg4[%c3_19, %c0_20] : memref<4x8xf32, #tpu.memory_space<vmem>>, vector<1x8xf32>
    %32 = vector.shape_cast %31 : vector<1x8xf32> to vector<8xf32>
    %33 = vector.shape_cast %30 : vector<8xf32> to vector<1x8xf32>
    tpu.vector_store %arg4[%c3_19, %c0_20], %33 {strides = array<i32>} : memref<4x8xf32, #tpu.memory_space<vmem>>, vector<1x8xf32>,
    return
  }
  func.func @transform_0(%arg0: i32, %arg1: i32) -> (i32, i32) {
    %c0_i32 = arith.constant 0 : i32
    %c0_i32_0 = arith.constant 0 : i32
    return %arg0, %c0_i32 : i32, i32
  }
  func.func @transform_1(%arg0: i32, %arg1: i32) -> (i32, i32, i32) {
    %c0_i32 = arith.constant 0 : i32
    %c0_i32_0 = arith.constant 0 : i32
    return %arg1, %arg0, %c0_i32 : i32, i32, i32
  }
  func.func @transform_2(%arg0: i32, %arg1: i32) -> (i32, i32) {
    %c0_i32 = arith.constant 0 : i32
    return %arg1, %arg0 : i32, i32
  }
}

</mosaic_0001>

<bundles_post_ra>
// kernel: _rank_forward_jit.1
= control target key start
LH: loop header
LB: loop body
LE: loop exit
PB: predicated region body
PF: predicated region fallthrough
CT: control target
= control target key end

     0   :  { %s152_s0 = inlined_call_operand.vmem [shape: bf16[8,32], index: 0, kind: input, shape index: {}]   ;;  %s153_s1 = inlined_call_operand.vmem [shape: bf16[4,8,32], index: 1, kind: input, shape index: {}]   ;;  %s154_s2 = inlined_call_operand.hbm [shape: f32[4,8], index: 2, kind: output, shape index: {}]  }
   0x1   :  { %v12_v0 = vld [vmem:[%s152_s0] sm:$0xf]  ;;  %v88_v1 = vld [vmem:[%s153_s1 + $0x8] sm:$0xff]  }
   0x2   :  { %v14_v2 = vld [vmem:[%s153_s1] sm:$0xff]   ;;  %v13_v3 = vunpack.c.l.bf16 %v12_v0  ;;  %v47_v4 = vunpack.c.l.bf16 %v88_v1  ;;  %v61_v6 = vunpack.c.h.bf16 %v88_v1 }
   0x3   :  { %v15_v5 = vunpack.c.l.bf16 %v14_v2 }
   0x4   :  { %7 = vsyncpa [#allocation3], 0  ;;  %vm17_vm0 = vcmask 261120   ;;  %v33_v7 = vunpack.c.h.bf16 %v14_v2  ;;  %v48_v8 = vmul.f32 %v47_v4, %v13_v3  ;;  %v62_v10 = vmul.f32 %v61_v6, %v13_v3  ;;  %s115_s0 = smov [#allocation2]  }
   0x5   :  { %v16_v9 = vmul.f32 %v15_v5, %v13_v3  ;;  %v22_v16 = vlaneseq  ;;  %vm29_vm1 = vcmask 57344   ;;  %s79_s1 = sshll.u32 %s115_s0, 4  ;;  %s80_s1 = int_to_ptr.vmem [resolvable:$true] %s79_s1 }
   0x6   :  { %v34_v11 = vmul.f32 %v33_v7, %v13_v3  ;;  %v49_v12 = vsel %vm17_vm0, %v48_v8, 0.0  ;;  %v63_v14 = vsel %vm17_vm0, %v62_v10, 0.0  ;;  %s91_s15 = scalar_lea.vmem %s80_s1, 64  ;;  %p96_p1 = scmp.lt.s32.totalorder %s80_s1, %s80_s1 }
   0x7   :  { %v18_v13 = vsel %vm17_vm0, %v16_v9, 0.0  ;;  %50 = vadd.xlane.f32.xlu1 %v49_v12  ;;  %v23_v17 = vand.u32 127, %v22_v16  ;;  %v25_v18 = vshrl.u32 %v22_v16, 7  ;;  %p92_p0 = scmp.ne.s32.totalorder %s80_s1, %s91_s15  ;;  %p97_p2 = scmp.lt.s32.totalorder %s91_s15, %s91_s15 }
   0x8   :  { %19 = vadd.xlane.f32.xlu0 %v18_v13  ;;  %v35_v15 = vsel %vm17_vm0, %v34_v11, 0.0 }
   0x9   :  { %v26_v19 = vsub.s32 %v23_v17, %v25_v18  ;;  %p98_p3 = por %p97_p2, %p96_p1 }
   0xb   :  { %64 = vadd.xlane.f32.xlu1 %v63_v14  ;;  %p99_p4 = pnand %p98_p3, %p92_p0 }
   0xc   :  { %36 = vadd.xlane.f32.xlu0 %v35_v15 }
  0x94   :  { %v51_v20 = vpop.xlane.xlu1 %50 }
  0x95   :  { %v20_v21 = vpop.xlane.xlu0 %19  ;;  %v56_v22 = vrot.slane %v51_v20, %v26_v19 }
  0x96   :  { %v27_v23 = vrot.slane %v20_v21, %v26_v19 }
  0x97   :  { %58 = vst.msk [vmem:[#allocation2 + $0x2] sm:$0x1] %vm29_vm1, %v56_v22 }
  0x98   :  { %30 = vst.msk [vmem:[#allocation2] sm:$0x1] %vm29_vm1, %v27_v23  ;;  %v65_v24 = vpop.xlane.xlu1 %64 }
  0x99   :  { %v37_v25 = vpop.xlane.xlu0 %36  ;;  %v70_v26 = vrot.slane %v65_v24, %v26_v19 }
  0x9a   :  { %v42_v27 = vrot.slane %v37_v25, %v26_v19 }
  0x9b   :  { %72 = vst.msk [vmem:[#allocation2 + $0x3] sm:$0x1] %vm29_vm1, %v70_v26 }
  0x9c   :  { %44 = vst.msk [vmem:[#allocation2 + $0x1] sm:$0x1] %vm29_vm1, %v42_v27 }
  0x9d   :  { %102 = shalt.err (!%p99_p4)
}
  0x9e   :  { %s103_s18 = scalar_lea.hbm %s154_s2, 64 }
  0x9f   :  { %p104_p5 = scmp.ne.s32.totalorder %s154_s2, %s103_s18  ;;  %p107_p6 = scmp.lt.u32.totalorder %s103_s18, %s154_s2 }
  0xa1   :  { %p109_p7 = pnand %p107_p6, %p104_p5 }
  0xa3   :  { %112 = shalt.err (!%p109_p7)
}
  0xa4   :  { %82 = dma.vmem_to_hbm [thread:$0]  %s80_s1, 64, %s154_s2, [#allocation3]  }
  0xa5   :  { %113 = dma.done.wait [#allocation3], 64  }
  0xa6   :  { %114 = vsyncadd [#allocation3], 4294967232 }
  0xa7   :  { %86 = vsyncpa [#allocation3], 1 }

</bundles_post_ra>
